<compile_context>
chip_gen: v7x
topology: tpu7x:2x2x1
jax: 0.10.0
libtpu: 0.0.40
codegen_flags: <defaults>
</compile_context>

<pallas_src>
import math
import jax
import jax.numpy as jnp
from jax.experimental import pallas as pl
from jax.experimental.pallas import tpu as pltpu

_INV_SQRT2 = 1.0 / math.sqrt(2.0)


def _round_up(x, m):
    return ((x + m - 1) // m) * m


def _make_adapter_kernel(add_residual):
    def kernel(alpha_ref, x_ref, dp_ref, up_ref, o_ref):
        # alpha_ref: (1, 1)            SMEM scalar
        # x_ref:     (tm, in_dim)      input row tile (native dtype)
        # dp_ref:    (in_dim, rank)    down projection (unpadded)
        # up_ref:    (rank, out_dim)   up projection   (unpadded)
        # o_ref:     (tm, out_dim)     output tile
        x = x_ref[...]
        h = jnp.dot(x, dp_ref[...], preferred_element_type=jnp.float32)
        # Exact (erf-based) GELU — matches torch.nn.GELU() default.
        h = 0.5 * h * (1.0 + jax.lax.erf(h * _INV_SQRT2))
        out = jnp.dot(h.astype(up_ref.dtype), up_ref[...],
                      preferred_element_type=jnp.float32)
        out = out * alpha_ref[0, 0]          # scale the f32 accumulator
        if add_residual:
            out = out + x.astype(jnp.float32)
        o_ref[...] = out.astype(o_ref.dtype)
    return kernel


def residual_adapter(x, down_proj, up_proj, alpha, *, tm=512, add_residual=False):
    """x: (..., in_dim) -> (..., out_dim).

    tm: row-tile size (auto-shrunk to a generation-aware VMEM budget and
    auto-capped at the row count).  add_residual=True fuses `x + adapter(x)`
    into the output store (requires out_dim == in_dim)."""
    in_dim, rank = down_proj.shape
    rank2, out_dim = up_proj.shape
    assert rank == rank2 and x.shape[-1] == in_dim
    if add_residual:
        assert out_dim == in_dim, "residual fusion requires out_dim == in_dim"

    lead = x.shape[:-1]
    x2d = x.reshape(-1, in_dim)
    M = x2d.shape[0]

    xb = jnp.dtype(x2d.dtype).itemsize            # activation element size
    wb = jnp.dtype(down_proj.dtype).itemsize      # weight element size
    sub = max(8, 32 // xb)                        # packed-sublane multiple

    # ---- generation-aware VMEM budgets -------------------------------------
    vmem_cap = 128 << 20
    try:
        info = pltpu.get_tpu_info()
        vmem_cap = int(getattr(info, "vmem_capacity_bytes", vmem_cap))
    except Exception:
        pass
    small_vmem = vmem_cap <= (96 << 20)           # v7x-class: 64 MiB / TC, 2 TCs
    tile_budget = (22 << 20) if small_vmem else (72 << 20)
    vmem_cap_limit = (52 << 20) if small_vmem else (100 << 20)

    # ---- row-tile selection -------------------------------------------------
    tm = max(sub, _round_up(min(tm, _round_up(M, sub)), sub))
    # Dual-TensorCore chips: make sure the parallel grid axis has >= 2 steps.
    if small_vmem and tm >= M and M > sub:
        tm = _round_up(pl.cdiv(M, 2), sub)

    def _vmem_need(tm_):
        return (2 * tm_ * (in_dim + out_dim) * xb            # x / out tiles (2-buf)
                + 2 * (in_dim * rank + rank * out_dim) * wb  # resident weights
                + tm_ * (rank + out_dim) * 4)                # f32 intermediates

    while tm > sub and _vmem_need(tm) > tile_budget:
        tm = max(sub, _round_up(tm // 2, sub))

    grid_m = pl.cdiv(M, tm)                       # ragged M: partial last block
    vmem_limit = int(min(max(_vmem_need(tm) + (4 << 20), 16 << 20), vmem_cap_limit))

    alpha2d = jnp.asarray(alpha, jnp.float32).reshape(1, 1)
    kernel = _make_adapter_kernel(add_residual)

    out = pl.pallas_call(
        kernel,
        out_shape=jax.ShapeDtypeStruct((M, out_dim), x.dtype),
        grid=(grid_m,),
        in_specs=[
            pl.BlockSpec(memory_space=pltpu.MemorySpace.SMEM),   # alpha scalar
            pl.BlockSpec((tm, in_dim), lambda i: (i, 0)),        # x row tile
            pl.BlockSpec((in_dim, rank), lambda i: (0, 0)),      # down_proj (full)
            pl.BlockSpec((rank, out_dim), lambda i: (0, 0)),     # up_proj   (full)
        ],
        out_specs=pl.BlockSpec((tm, out_dim), lambda i: (i, 0)),
        compiler_params=pltpu.CompilerParams(
            dimension_semantics=("parallel",),
            vmem_limit_bytes=vmem_limit),
    )(alpha2d, x2d, down_proj, up_proj)

    return out.reshape(*lead, out_dim)


if __name__ == "__main__":
    # Small shapes consistent with the module: x @ (in_dim, rank) @ (rank, out_dim)
    batch, seq, in_dim, out_dim, rank = 2, 8, 32, 32, 8

    key = jax.random.PRNGKey(0)
    kx, kd, ku = jax.random.split(key, 3)

    x = jax.random.normal(kx, (batch, seq, in_dim), dtype=jnp.float32)

    std_dev = 1.0 / math.sqrt(rank)
    down_proj = jax.random.normal(kd, (in_dim, rank), jnp.float32) * std_dev
    # Module __init__ zeros up_proj; use small random values here so the
    # numerical check is non-trivial (deterministic, synthetic weights).
    up_proj = jax.random.normal(ku, (rank, out_dim), jnp.float32) * 0.02
    alpha = jnp.float32(1.0 / 16.0)

    # Pure-JAX reference (exact GELU, matching torch.nn.GELU default).
    h = x.reshape(-1, in_dim) @ down_proj
    h = 0.5 * h * (1.0 + jax.lax.erf(h / math.sqrt(2.0)))
    ref = (h @ up_proj * alpha).reshape(batch, seq, out_dim)

    # 1) Module-exact forward (no residual add, as in the reference forward()).
    out = residual_adapter(x, down_proj, up_proj, alpha)
    out = jax.block_until_ready(out)
    assert out.shape == (batch, seq, out_dim)
    assert jnp.allclose(out, ref, atol=1e-5, rtol=1e-5), "mismatch vs reference"

    # 2) Optional fused-residual path (x + adapter(x)), as used by the caller.
    out_res = residual_adapter(x, down_proj, up_proj, alpha, add_residual=True)
    out_res = jax.block_until_ready(out_res)
    assert jnp.allclose(out_res, x + ref, atol=1e-5, rtol=1e-5), \
        "mismatch vs residual reference"

    print("KERNEL_OK")
</pallas_src>

<mosaic_0001>
module attributes {stable_mosaic.version = 11 : i64} {
  func.func @kernel(%arg0: i32, %arg1: memref<1x1xf32, #tpu.memory_space<smem>>, %arg2: memref<16x32xf32, #tpu.memory_space<vmem>>, %arg3: memref<32x8xf32, #tpu.memory_space<vmem>>, %arg4: memref<8x32xf32, #tpu.memory_space<vmem>>, %arg5: memref<16x32xf32, #tpu.memory_space<vmem>>) attributes {dimension_semantics = [#tpu.dimension_semantics<parallel>], iteration_bounds = array<i64: 1>, scalar_prefetch = 0 : i64, scratch_operands = 0 : i64, tpu.core_type = #tpu.core_type<tc>, window_params = [{transform_indices = @transform_0, window_bounds = array<i64: 1, 1>}, {transform_indices = @transform_1, window_bounds = array<i64: 16, 32>}, {pipeline_mode = #tpu.pipeline_mode<synchronous>, transform_indices = @transform_2, window_bounds = array<i64: 32, 8>}, {pipeline_mode = #tpu.pipeline_mode<synchronous>, transform_indices = @transform_3, window_bounds = array<i64: 8, 32>}, {transform_indices = @transform_4, window_bounds = array<i64: 16, 32>}]} {
    %c0 = arith.constant 0 : index
    %c0_0 = arith.constant 0 : index
    %0 = vector.load %arg2[%c0, %c0_0] : memref<16x32xf32, #tpu.memory_space<vmem>>, vector<16x32xf32>
    %c0_1 = arith.constant 0 : index
    %c0_2 = arith.constant 0 : index
    %1 = vector.load %arg3[%c0_1, %c0_2] : memref<32x8xf32, #tpu.memory_space<vmem>>, vector<32x8xf32>
    %cst = arith.constant dense<0.000000e+00> : vector<16x8xf32>
    %2 = tpu.matmul %0, %1, %cst {dimension_numbers = #tpu.dot_dimension_numbers<[1], [0], [0], [1], [0, 0, 1, 1], [], []>} : vector<16x32xf32>, vector<32x8xf32>, vector<16x8xf32> -> vector<16x8xf32>
    %cst_3 = arith.constant 5.000000e-01 : f32
    %3 = vector.broadcast %cst_3 : f32 to vector<16x8xf32>
    %4 = arith.mulf %3, %2 : vector<16x8xf32>
    %cst_4 = arith.constant 0.707106769 : f32
    %5 = vector.broadcast %cst_4 : f32 to vector<16x8xf32>
    %6 = arith.mulf %2, %5 : vector<16x8xf32>
    %7 = math.erf %6 : vector<16x8xf32>
    %cst_5 = arith.constant 1.000000e+00 : f32
    %8 = vector.broadcast %cst_5 : f32 to vector<16x8xf32>
    %9 = arith.addf %8, %7 : vector<16x8xf32>
    %10 = arith.mulf %4, %9 : vector<16x8xf32>
    %c0_6 = arith.constant 0 : index
    %c0_7 = arith.constant 0 : index
    %11 = vector.load %arg4[%c0_6, %c0_7] : memref<8x32xf32, #tpu.memory_space<vmem>>, vector<8x32xf32>
    %cst_8 = arith.constant dense<0.000000e+00> : vector<16x32xf32>
    %12 = tpu.matmul %10, %11, %cst_8 {dimension_numbers = #tpu.dot_dimension_numbers<[1], [0], [0], [1], [0, 0, 1, 1], [], []>} : vector<16x8xf32>, vector<8x32xf32>, vector<16x32xf32> -> vector<16x32xf32>
    %c0_9 = arith.constant 0 : index
    %c0_10 = arith.constant 0 : index
    %13 = memref.load %arg1[%c0_9, %c0_10] : memref<1x1xf32, #tpu.memory_space<smem>>
    %14 = vector.broadcast %13 : f32 to vector<16x32xf32>
    %15 = arith.mulf %12, %14 : vector<16x32xf32>
    %c0_11 = arith.constant 0 : index
    %c0_12 = arith.constant 0 : index
    %16 = vector.load %arg5[%c0_11, %c0_12] : memref<16x32xf32, #tpu.memory_space<vmem>>, vector<16x32xf32>
    tpu.vector_store %arg5[%c0_11, %c0_12], %15 {strides = array<i32>} : memref<16x32xf32, #tpu.memory_space<vmem>>, vector<16x32xf32>,
    return
  }
  func.func @transform_0(%arg0: i32) -> (i32, i32) {
    %c0_i32 = arith.constant 0 : i32
    %c0_i32_0 = arith.constant 0 : i32
    %c0_i32_1 = arith.constant 0 : i32
    return %c0_i32, %c0_i32_0 : i32, i32
  }
  func.func @transform_1(%arg0: i32) -> (i32, i32) {
    %c0_i32 = arith.constant 0 : i32
    %c0_i32_0 = arith.constant 0 : i32
    return %arg0, %c0_i32 : i32, i32
  }
  func.func @transform_2(%arg0: i32) -> (i32, i32) {
    %c0_i32 = arith.constant 0 : i32
    %c0_i32_0 = arith.constant 0 : i32
    %c0_i32_1 = arith.constant 0 : i32
    return %c0_i32, %c0_i32_0 : i32, i32
  }
  func.func @transform_3(%arg0: i32) -> (i32, i32) {
    %c0_i32 = arith.constant 0 : i32
    %c0_i32_0 = arith.constant 0 : i32
    %c0_i32_1 = arith.constant 0 : i32
    return %c0_i32, %c0_i32_0 : i32, i32
  }
  func.func @transform_4(%arg0: i32) -> (i32, i32) {
    %c0_i32 = arith.constant 0 : i32
    %c0_i32_0 = arith.constant 0 : i32
    return %arg0, %c0_i32 : i32, i32
  }
}

</mosaic_0001>

<bundles_post_ra>
// kernel: tpu_custom_call.1
= control target key start
LH: loop header
LB: loop body
LE: loop exit
PB: predicated region body
PF: predicated region fallthrough
CT: control target
= control target key end

     0   :  { %vm25_vm0 = vcmask 261120   ;;  %s358_s0 = inlined_call_operand.<no memory space> [shape: f32[1,1], index: 0, kind: input, shape index: {}]   ;;  %s359_s1 = inlined_call_operand.vmem [shape: f32[16,32], index: 1, kind: input, shape index: {}]   ;;  %s360_s2 = inlined_call_operand.vmem [shape: f32[32,8], index: 2, kind: input, shape index: {}]   ;;  %s361_s3 = inlined_call_operand.vmem [shape: f32[8,32], index: 3, kind: input, shape index: {}]   ;;  %s362_s4 = inlined_call_operand.hbm [shape: f32[16,32], index: 4, kind: output, shape index: {}]  }
   0x1   :  { %v21_v0 = vld [vmem:[%s360_s2] sm:$0xff]  ;;  %v22_v1 = vld [vmem:[%s360_s2 + $0x8] sm:$0xff]  ;;  %v23_v2 = vld [vmem:[%s360_s2 + $0x10] sm:$0xff] }
   0x2   :  { %v251_v3 = vpack.c.bf16 %v22_v1, %v21_v0  ;;  %v24_v4 = vld [vmem:[%s360_s2 + $0x18] sm:$0xff]  ;;  %v19_v5 = vld [vmem:[%s359_s1] sm:$0xff] }
   0x3   :  { %v255_v6 = vpack.c.bf16 %v24_v4, %v23_v2  ;;  %243 = vmatprep.mubr.msk.f32.mxu0 %vm25_vm0, %v19_v5 }
   0x4   :  { %10 = vsyncpa [#allocation4], 0  ;;  %252 = vmatprep.subr.bf16.mxu0 %v251_v3  ;;  %v20_v7 = vld [vmem:[%s359_s1 + $0x8] sm:$0xff]  ;;  %v117_v8 = vld [vmem:[%s361_s3] sm:$0xff]  ;;  %vm118_vm1 = vcmask 64512   ;;  %v201_v21 = vstv %s358_s0  ;;  %s290_s28 = smov [#allocation3]  }
   0x5   :  { %254 = vmatpush3.bf16.msra.mxu0 %v251_v3  ;;  %246 = vmatprep.subr.mxu1 %v117_v8  ;;  %s211_s29 = sshll.u32 %s290_s28, 4  ;;  %s212_s29 = int_to_ptr.vmem [resolvable:$true] %s211_s29 }
   0x6   :  { %256 = vmatprep.subr.bf16.mxu0 %v255_v6  ;;  %247 = vmatpush3.msra.mxu1 %v117_v8  ;;  %s266_s30 = scalar_lea.vmem %s212_s29, 256  ;;  %p271_p1 = scmp.lt.s32.totalorder %s212_s29, %s212_s29 }
   0x7   :  { %p267_p0 = scmp.ne.s32.totalorder %s212_s29, %s266_s30  ;;  %p272_p2 = scmp.lt.s32.totalorder %s266_s30, %s266_s30 }
   0x9   :  { %258 = vmatpush3.bf16.msra.mxu0 %v255_v6  ;;  %p273_p3 = por %p272_p2, %p271_p1 }
   0xb   :  { %p274_p4 = pnand %p273_p3, %p267_p0 }
   0xc   :  { %244 = vmatmul.mubr.msk.f32.vlgmr.msra.gmra.mrb[0].mxu0 %vm25_vm0, %v20_v7 }
  0xdf   :  { %v245_v9 = vpop.f32.mrb[0].mxu0 }
  0xe0   :  { %v110_v10 = vmul.f32 0.70710677, %v245_v9  ;;  %v98_v11 = vpop.f32.mrb[1].mxu0  ;;  %v108_v18 = vmul.f32 0.5, %v245_v9 }
  0xe1   :  { %v109_v12 = vmul.f32 0.70710677, %v98_v11  ;;  %v107_v16 = vmul.f32 0.5, %v98_v11 }
  0xe2   :  { %262 = verf.f32 %v110_v10 }
  0xe3   :  { %264 = verf.f32 %v109_v12 }
  0xec   :  { %v263_v13 = vpop.eup %262 }
  0xed   :  { %v265_v14 = vpop.eup %264  ;;  %v114_v15 = vadd.f32 1.0, %v263_v13 }
  0xee   :  { %v113_v17 = vadd.f32 1.0, %v265_v14 }
  0xef   :  { %v116_v20 = vmul.f32 %v114_v15, %v108_v18 }
  0xf0   :  { %v115_v19 = vmul.f32 %v113_v17, %v107_v16 }
  0xf2   :  { %248 = vmatprep.mubr.msk.f32.mxu1 %vm118_vm1, %v115_v19 }
  0xf3   :  { %249 = vmatmul.mubr.msk.f32.vlgmr.msra.gmra.mrb[0].mxu1 %vm118_vm1, %v116_v20 }
 0x1c6   :  { %v250_v22 = vpop.f32.mrb[0].mxu1 }
 0x1c7   :  { %v203_v23 = vmul.f32 %v250_v22, %v201_v21  ;;  %v191_v24 = vpop.f32.mrb[1].mxu1 }
 0x1c8   :  { %v202_v25 = vmul.f32 %v201_v21, %v191_v24 }
 0x1c9   :  { %205 = vst.msk [vmem:[#allocation3 + $0x8] sm:$0xff] %vm25_vm0, %v203_v23 }
 0x1ca   :  { %204 = vst.msk [vmem:[#allocation3] sm:$0xff] %vm25_vm0, %v202_v25 }
 0x1cb   :  { %277 = shalt.err (!%p274_p4)
}
 0x1cc   :  { %s278_s6 = scalar_lea.hbm %s362_s4, 256 }
 0x1cd   :  { %p279_p5 = scmp.ne.s32.totalorder %s362_s4, %s278_s6  ;;  %p282_p6 = scmp.lt.u32.totalorder %s278_s6, %s362_s4 }
 0x1cf   :  { %p284_p7 = pnand %p282_p6, %p279_p5 }
 0x1d1   :  { %287 = shalt.err (!%p284_p7)
}
 0x1d2   :  { %s291_s11 = smov 128   ;;  %s292_s12 = smov 8  }
 0x1d3   :  { %217 = dma.vmem_to_hbm [thread:$0]  %s212_s29, 256, %s362_s4, [#allocation4], %s291_s11, %s291_s11, %s292_s12  }
 0x1d4   :  { %288 = dma.done.wait [#allocation4], 256  }
 0x1d5   :  { %289 = vsyncadd [#allocation4], 4294967040 }
 0x1d6   :  { %221 = vsyncpa [#allocation4], 1 }

</bundles_post_ra>
